<compile_context>
chip_gen: v5e
topology: v5e:2x2
jax: 0.10.0
libtpu: 0.0.40
codegen_flags: <defaults>
</compile_context>

<pallas_src>
import functools

import jax
import jax.numpy as jnp
from jax.experimental import pallas as pl
from jax.experimental.pallas import tpu as pltpu


# ----------------------------- Pallas kernel --------------------------------
def _mlp_kernel(*refs, num_layers: int):
    """Fused MLP: refs = (x, w0, b0, w1, b1, ..., w_{L-1}, b_{L-1}, out).

    x: (Bp, K0p) f32, w_i: (K_ip, N_ip) bf16, b_i: (1, N_ip) f32, out: f32.
    Activation stays in vregs/VMEM across all layers (no HBM round trips).
    """
    x_ref = refs[0]
    o_ref = refs[-1]

    h = x_ref[...]  # f32
    for i in range(num_layers):  # static Python loop — fully unrolled
        w_ref = refs[1 + 2 * i]
        b_ref = refs[2 + 2 * i]
        # bf16 MXU matmul, f32 accumulation.
        h = jnp.dot(h.astype(jnp.bfloat16), w_ref[...],
                    preferred_element_type=jnp.float32)
        h = h + b_ref[...]           # f32 epilogue
        if i != num_layers - 1:      # ReLU between layers, not after last
            h = jnp.maximum(h, 0.0)
    o_ref[...] = h.astype(o_ref.dtype)


def _round_up(n: int, m: int) -> int:
    return ((n + m - 1) // m) * m


# ------------------------- cached parameter padding ---------------------------
def _prepare_padded_params(params):
    """Pad once: K0 -> multiple of 16 (bf16 sublane pack), feature dims -> 128.

    Returns tuple of (w_bf16[K_p, N_p], b_f32[1, N_p]) per layer.
    """
    indim = params[0][0].shape[0]
    dims = [indim] + [w.shape[1] for (w, _) in params]
    dims_p = [_round_up(indim, 16)] + [_round_up(d, 128) for d in dims[1:]]

    padded = []
    for i, (w, b) in enumerate(params):
        din, dout = w.shape
        w_p = jnp.pad(w, ((0, dims_p[i] - din),
                          (0, dims_p[i + 1] - dout))).astype(jnp.bfloat16)
        b_p = jnp.pad(b, (0, dims_p[i + 1] - dout)).reshape(
            1, dims_p[i + 1]).astype(jnp.float32)
        padded.append((w_p, b_p))
    return tuple(padded)


# ------------------------------ fused forward --------------------------------
def _mlp_forward_padded(x, padded_params, *, out_dim_last: int):
    """x: (batch, indim) f32; padded_params: cached, pre-padded bf16 weights."""
    batch, indim = x.shape
    num_layers = len(padded_params)

    bp = _round_up(batch, 8)                     # sublane multiple
    k0p = padded_params[0][0].shape[0]           # padded layer-0 K
    x_p = jnp.pad(x, ((0, bp - batch), (0, k0p - indim)))

    args = [x_p]
    flops = 0
    bytes_accessed = x_p.size * 4
    for (w_p, b_p) in padded_params:
        args += [w_p, b_p]
        flops += 2 * bp * w_p.shape[0] * w_p.shape[1]
        bytes_accessed += w_p.size * 2 + b_p.size * 4
    out_np = padded_params[-1][0].shape[1]
    bytes_accessed += bp * out_np * 4

    # Resident VMEM footprint (gridless: no pipeline double-buffers).
    footprint = bytes_accessed + bp * out_np * 4
    vmem_limit = max(32 << 20, min(int(1.25 * footprint) + (2 << 20), 100 << 20))

    kernel = functools.partial(_mlp_kernel, num_layers=num_layers)
    out_p = pl.pallas_call(
        kernel,
        out_shape=jax.ShapeDtypeStruct((bp, out_np), jnp.float32),
        # Gridless: whole arrays resident in VMEM, body runs once.
        in_specs=[pl.BlockSpec(memory_space=pltpu.MemorySpace.VMEM)] * len(args),
        out_specs=pl.BlockSpec(memory_space=pltpu.MemorySpace.VMEM),
        compiler_params=pltpu.CompilerParams(vmem_limit_bytes=vmem_limit),
        cost_estimate=pl.CostEstimate(
            flops=flops, transcendentals=0, bytes_accessed=bytes_accessed),
    )(*args)

    # Slice padding back off (inside jit, so it fuses with the call).
    return out_p[:batch, :out_dim_last]


# --------------------------- Module equivalent -------------------------------
class Classification:
    """JAX/Pallas equivalent of the PyTorch Classification module."""

    def __init__(self, indim, out_dim, num_layers, key):
        self.indim = indim
        self.out_dim = out_dim
        self.layers = num_layers
        self.params = []  # list of (W[in, out] f32, b[out] f32)
        d_in = indim
        for i in range(num_layers):
            d_out = out_dim[i]
            key, kw, kb = jax.random.split(key, 3)
            # Mimic nn.Linear's uniform(-1/sqrt(in), 1/sqrt(in)) init.
            bound = 1.0 / float(d_in) ** 0.5
            w = jax.random.uniform(kw, (d_in, d_out), jnp.float32, -bound, bound)
            b = jax.random.uniform(kb, (d_out,), jnp.float32, -bound, bound)
            self.params.append((w, b))
            d_in = d_out

        # Pad/cast parameters ONCE; jit the full fused forward path once.
        self._padded_params = _prepare_padded_params(self.params)
        self._apply = jax.jit(
            functools.partial(_mlp_forward_padded, out_dim_last=out_dim[-1]))

    def forward(self, x):
        inter = x
        out = self._apply(x, self._padded_params)  # one fused, jitted kernel
        if self.layers == 1:
            assert inter.shape[-1] == self.indim
        inter = inter[jnp.newaxis, :]
        return out, inter


# --------------------------------- main --------------------------------------
if __name__ == "__main__":
    key = jax.random.PRNGKey(0)
    key, kx = jax.random.split(key)

    batch = 8
    indim = 32
    out_dims = [64, 128, 16]
    num_layers = len(out_dims)

    x = jax.random.normal(kx, (batch, indim), jnp.float32)

    model = Classification(indim, out_dims, num_layers, key)
    out, inter = model.forward(x)
    jax.block_until_ready(out)
    jax.block_until_ready(inter)

    # Second call exercises the cached jit (no retrace / no re-pad of params).
    out2, _ = model.forward(x)
    jax.block_until_ready(out2)

    # Pure-JAX reference matching the kernel's bf16-matmul / f32-epilogue path.
    ref = x
    for i, (w, b) in enumerate(model.params):
        ref = jnp.dot(ref.astype(jnp.bfloat16), w.astype(jnp.bfloat16),
                      preferred_element_type=jnp.float32) + b
        if i != num_layers - 1:
            ref = jnp.maximum(ref, 0.0)

    assert out.shape == (batch, out_dims[-1])
    assert inter.shape == (1, batch, indim)
    assert jnp.allclose(out, ref, atol=1e-2, rtol=1e-2)
    assert jnp.allclose(out, out2)
    assert jnp.allclose(inter[0], x)

    print("KERNEL_OK")
</pallas_src>

<mosaic_0001>
module attributes {stable_mosaic.version = 11 : i64} {
  func.func @_mlp_kernel(%arg0: memref<8x32xf32, #tpu.memory_space<vmem>>, %arg1: memref<32x128xbf16, #tpu.memory_space<vmem>>, %arg2: memref<1x128xf32, #tpu.memory_space<vmem>>, %arg3: memref<128x128xbf16, #tpu.memory_space<vmem>>, %arg4: memref<1x128xf32, #tpu.memory_space<vmem>>, %arg5: memref<128x128xbf16, #tpu.memory_space<vmem>>, %arg6: memref<1x128xf32, #tpu.memory_space<vmem>>, %arg7: memref<8x128xf32, #tpu.memory_space<vmem>>) attributes {dimension_semantics = [], scalar_prefetch = 0 : i64, scratch_operands = 0 : i64, tpu.core_type = #tpu.core_type<tc>} {
    %c0 = arith.constant 0 : index
    %c0_0 = arith.constant 0 : index
    %0 = vector.load %arg0[%c0, %c0_0] : memref<8x32xf32, #tpu.memory_space<vmem>>, vector<8x32xf32>
    %1 = arith.truncf %0 : vector<8x32xf32> to vector<8x32xbf16>
    %c0_1 = arith.constant 0 : index
    %c0_2 = arith.constant 0 : index
    %2 = vector.load %arg1[%c0_1, %c0_2] : memref<32x128xbf16, #tpu.memory_space<vmem>>, vector<32x128xbf16>
    %cst = arith.constant dense<0.000000e+00> : vector<8x128xf32>
    %3 = tpu.matmul %1, %2, %cst {dimension_numbers = #tpu.dot_dimension_numbers<[1], [0], [0], [1], [0, 0, 1, 1], [], []>} : vector<8x32xbf16>, vector<32x128xbf16>, vector<8x128xf32> -> vector<8x128xf32>
    %c0_3 = arith.constant 0 : index
    %c0_4 = arith.constant 0 : index
    %4 = vector.load %arg2[%c0_3, %c0_4] : memref<1x128xf32, #tpu.memory_space<vmem>>, vector<1x128xf32>
    %5 = vector.broadcast %4 : vector<1x128xf32> to vector<8x128xf32>
    %6 = arith.addf %3, %5 : vector<8x128xf32>
    %cst_5 = arith.constant 0.000000e+00 : f32
    %7 = vector.broadcast %cst_5 : f32 to vector<8x128xf32>
    %8 = arith.maximumf %6, %7 : vector<8x128xf32>
    %9 = arith.truncf %8 : vector<8x128xf32> to vector<8x128xbf16>
    %c0_6 = arith.constant 0 : index
    %c0_7 = arith.constant 0 : index
    %10 = vector.load %arg3[%c0_6, %c0_7] : memref<128x128xbf16, #tpu.memory_space<vmem>>, vector<128x128xbf16>
    %cst_8 = arith.constant dense<0.000000e+00> : vector<8x128xf32>
    %11 = tpu.matmul %9, %10, %cst_8 {dimension_numbers = #tpu.dot_dimension_numbers<[1], [0], [0], [1], [0, 0, 1, 1], [], []>} : vector<8x128xbf16>, vector<128x128xbf16>, vector<8x128xf32> -> vector<8x128xf32>
    %c0_9 = arith.constant 0 : index
    %c0_10 = arith.constant 0 : index
    %12 = vector.load %arg4[%c0_9, %c0_10] : memref<1x128xf32, #tpu.memory_space<vmem>>, vector<1x128xf32>
    %13 = vector.broadcast %12 : vector<1x128xf32> to vector<8x128xf32>
    %14 = arith.addf %11, %13 : vector<8x128xf32>
    %cst_11 = arith.constant 0.000000e+00 : f32
    %15 = vector.broadcast %cst_11 : f32 to vector<8x128xf32>
    %16 = arith.maximumf %14, %15 : vector<8x128xf32>
    %17 = arith.truncf %16 : vector<8x128xf32> to vector<8x128xbf16>
    %c0_12 = arith.constant 0 : index
    %c0_13 = arith.constant 0 : index
    %18 = vector.load %arg5[%c0_12, %c0_13] : memref<128x128xbf16, #tpu.memory_space<vmem>>, vector<128x128xbf16>
    %cst_14 = arith.constant dense<0.000000e+00> : vector<8x128xf32>
    %19 = tpu.matmul %17, %18, %cst_14 {dimension_numbers = #tpu.dot_dimension_numbers<[1], [0], [0], [1], [0, 0, 1, 1], [], []>} : vector<8x128xbf16>, vector<128x128xbf16>, vector<8x128xf32> -> vector<8x128xf32>
    %c0_15 = arith.constant 0 : index
    %c0_16 = arith.constant 0 : index
    %20 = vector.load %arg6[%c0_15, %c0_16] : memref<1x128xf32, #tpu.memory_space<vmem>>, vector<1x128xf32>
    %21 = vector.broadcast %20 : vector<1x128xf32> to vector<8x128xf32>
    %22 = arith.addf %19, %21 : vector<8x128xf32>
    %c0_17 = arith.constant 0 : index
    %c0_18 = arith.constant 0 : index
    %23 = vector.load %arg7[%c0_17, %c0_18] : memref<8x128xf32, #tpu.memory_space<vmem>>, vector<8x128xf32>
    tpu.vector_store %arg7[%c0_17, %c0_18], %22 {strides = array<i32>} : memref<8x128xf32, #tpu.memory_space<vmem>>, vector<8x128xf32>,
    return
  }
}

</mosaic_0001>

<bundles_post_ra>
// kernel: _mlp_forward_padded.1
= control target key start
LH: loop header
LB: loop body
LE: loop exit
PB: predicated region body
PF: predicated region fallthrough
CT: control target
= control target key end

     0   :  { %12 = vsyncpa [#allocation3], 0  ;;  %s614_s0 = inlined_call_operand.hbm [shape: f32[8,32], index: 0, kind: input, shape index: {}]   ;;  %s615_s1 = inlined_call_operand.hbm [shape: bf16[32,128], index: 1, kind: input, shape index: {}]   ;;  %s616_s2 = inlined_call_operand.vmem [shape: f32[1,128], index: 2, kind: input, shape index: {}]   ;;  %s617_s3 = inlined_call_operand.hbm [shape: bf16[128,128], index: 3, kind: input, shape index: {}]   ;;  %s618_s4 = inlined_call_operand.vmem [shape: f32[1,128], index: 4, kind: input, shape index: {}]   ;;  %s619_s5 = inlined_call_operand.hbm [shape: bf16[128,128], index: 5, kind: input, shape index: {}]   ;;  %s620_s6 = inlined_call_operand.vmem [shape: f32[1,128], index: 6, kind: input, shape index: {}]   ;;  %s621_s7 = inlined_call_operand.hbm [shape: f32[8,128], index: 7, kind: output, shape index: {}]  }
   0x1   :  { %13 = vsyncpa [#allocation6], 0 }
   0x2   :  { %14 = vsyncpa [#allocation9], 0  ;;  %s31_s26 = sshll.u32 %s615_s1, 4  ;;  %s32_s26 = int_to_ptr.hbm [resolvable:$true] %s31_s26 }
   0x3   :  { %15 = vsyncpa [#allocation4], 0  ;;  %s543_s27 = smov [#allocation5]   ;;  %s21_s8 = sshll.u32 %s614_s0, 4  ;;  %s22_s8 = int_to_ptr.hbm [resolvable:$true] %s21_s8 }
   0x4   :  { %s33_s28 = sshll.u32 %s543_s27, 4  ;;  %s544_s9 = smov 64   ;;  %s34_s28 = int_to_ptr.vmem [resolvable:$true] %s33_s28 }
   0x5   :  { %s545_s10 = smov 4   ;;  %s546_s11 = smov [#allocation2]  }
   0x6   :  { %39 = dma.hbm_to_vmem [thread:$0]  %s32_s26, 256, %s34_s28, [#allocation6], %s544_s9, %s544_s9, %s545_s10  }
   0x7   :  { %s23_s12 = sshll.u32 %s546_s11, 4  ;;  %s46_s15 = sshll.u32 %s617_s3, 4  ;;  %s24_s12 = int_to_ptr.vmem [resolvable:$true] %s23_s12  ;;  %s47_s15 = int_to_ptr.hbm [resolvable:$true] %s46_s15 }
   0x8   :  { %26 = dma.hbm_to_vmem [thread:$0]  %s22_s8, 128, %s24_s12, [#allocation3]  }
   0x9   :  { %s61_s17 = sshll.u32 %s619_s5, 4  ;;  %s547_s18 = smov [#allocation7]   ;;  %s62_s17 = int_to_ptr.hbm [resolvable:$true] %s61_s17 }
   0xa   :  { %s48_s19 = sshll.u32 %s547_s18, 4  ;;  %s548_s0 = smov [#allocation8]   ;;  %s49_s19 = int_to_ptr.vmem [resolvable:$true] %s48_s19 }
   0xb   :  { %54 = dma.hbm_to_vmem [thread:$0]  %s47_s15, 1024, %s49_s19, [#allocation6], %s544_s9, %s544_s9, %s545_s10  }
   0xc   :  { %s63_s20 = sshll.u32 %s548_s0, 4  ;;  %s64_s20 = int_to_ptr.vmem [resolvable:$true] %s63_s20 }
   0xd   :  { %69 = dma.hbm_to_vmem [thread:$0]  %s62_s17, 1024, %s64_s20, [#allocation9], %s544_s9, %s544_s9, %s545_s10  }
   0xe   :  { %535 = dma.done.wait [#allocation3], 128  }
   0xf   :  { %536 = vsyncadd [#allocation3], 4294967168 }
  0x10   :  { %537 = dma.done.wait [#allocation6], 1280  }
  0x11   :  { %538 = vsyncadd [#allocation6], 4294966016 }
  0x12   :  { %539 = dma.done.wait [#allocation9], 1024  }
  0x13   :  { %540 = vsyncadd [#allocation9], 4294966272  ;;  %v388_v0 = vld [vmem:[#allocation5 + $0x8] sm:$0xff]  ;;  %v387_v2 = vld [vmem:[#allocation5] sm:$0xff]  ;;  %vm111_vm0 = vcmask 261120   ;;  %s549_s24 = smov [#allocation10]  }
  0x14   :  { %v396_v1 = vld [vmem:[#allocation7 + $0x38] sm:$0xff]  ;;  %121 = vmatpush.bf16.msra.mxu0 %v388_v0  ;;  %v89_v3 = vld [vmem:[#allocation2] sm:$0xff]  ;;  %v395_v4 = vld [vmem:[#allocation7 + $0x30] sm:$0xff]  ;;  %s300_s25 = sshll.u32 %s549_s24, 4  ;;  %s302_s28 = sshll.u32 %s621_s7, 4  ;;  %s301_s25 = int_to_ptr.vmem [resolvable:$true] %s300_s25  ;;  %s303_s28 = int_to_ptr.hbm [resolvable:$true] %s302_s28 }
  0x15   :  { %198 = vmatpush.bf16.msra.mxu1 %v396_v1  ;;  %v90_v5 = vpack.c.bf16 %v89_v3, %v89_v3  ;;  %v394_v6 = vld [vmem:[#allocation7 + $0x28] sm:$0xff]  ;;  %v393_v7 = vld [vmem:[#allocation7 + $0x20] sm:$0xff]  ;;  %v392_v8 = vld [vmem:[#allocation7 + $0x18] sm:$0xff] }
  0x16   :  { %v391_v9 = vld [vmem:[#allocation7 + $0x10] sm:$0xff]  ;;  %v390_v10 = vld [vmem:[#allocation7 + $0x8] sm:$0xff]  ;;  %v389_v11 = vld [vmem:[#allocation7] sm:$0xff] }
  0x17   :  { %v404_v12 = vld [vmem:[#allocation8 + $0x38] sm:$0xff]  ;;  %v403_v13 = vld [vmem:[#allocation8 + $0x30] sm:$0xff]  ;;  %v402_v14 = vld [vmem:[#allocation8 + $0x28] sm:$0xff] }
  0x18   :  { %122 = vmatpush.bf16.msra.mxu0 %v387_v2  ;;  %281 = vmatpush.bf16.msra.mxu2 %v404_v12  ;;  %v401_v15 = vld [vmem:[#allocation8 + $0x20] sm:$0xff]  ;;  %v400_v16 = vld [vmem:[#allocation8 + $0x18] sm:$0xff]  ;;  %v399_v17 = vld [vmem:[#allocation8 + $0x10] sm:$0xff] }
  0x19   :  { %199 = vmatpush.bf16.msra.mxu1 %v395_v4  ;;  %v412_v18 = vld [vmem:[%s616_s2] ss:$0 sm:$0xff]  ;;  %v397_v25 = vld [vmem:[#allocation8] sm:$0xff] }
  0x1a   :  { %v398_v24 = vld [vmem:[#allocation8 + $0x8] sm:$0xff] }
  0x1b   :  { %322 = vmatmul.msk.bf16.vlgmr.msra.gmra.mxu0 %vm111_vm0, %v90_v5  ;;  %v413_v26 = vld [vmem:[%s618_s4] ss:$0 sm:$0xff] }
  0x1c   :  { %282 = vmatpush.bf16.msra.mxu2 %v403_v13  ;;  %v414_v32 = vld [vmem:[%s620_s6] ss:$0 sm:$0xff] }
  0x1d   :  { %200 = vmatpush.bf16.msra.mxu1 %v394_v6 }
  0x20   :  { %283 = vmatpush.bf16.msra.mxu2 %v402_v14 }
  0x21   :  { %201 = vmatpush.bf16.msra.mxu1 %v393_v7 }
  0x24   :  { %284 = vmatpush.bf16.msra.mxu2 %v401_v15 }
  0x25   :  { %202 = vmatpush.bf16.msra.mxu1 %v392_v8 }
  0x28   :  { %285 = vmatpush.bf16.msra.mxu2 %v400_v16 }
  0x29   :  { %203 = vmatpush.bf16.msra.mxu1 %v391_v9 }
  0x2c   :  { %286 = vmatpush.bf16.msra.mxu2 %v399_v17 }
  0x2d   :  { %204 = vmatpush.bf16.msra.mxu1 %v390_v10 }
  0x30   :  { %287 = vmatpush.bf16.msra.mxu2 %v398_v24 }
  0x31   :  { %205 = vmatpush.bf16.msra.mxu1 %v389_v11 }
  0x34   :  { %288 = vmatpush.bf16.msra.mxu2 %v397_v25 }
  0x98   :  { %v124_v19 = vpop.f32.mrf.mxu0 }
  0x99   :  { %v125_v20 = vadd.f32 %v412_v18, %v124_v19 }
  0x9b   :  { %v128_v21 = vmax.f32 %v125_v20, 0.0 }
  0x9d   :  { %v129_v22 = vpack.c.bf16 %v128_v21, %v128_v21 }
  0x9f   :  { %206 = vmatmul.bf16.vlgmr.msra.gmra.mxu1 %v129_v22 }
  0xa0   :  { %v126_v23 = vpop.f32.mrf.mxu0 }
 0x11c   :  { %v207_v27 = vpop.f32.mrf.mxu1 }
 0x11d   :  { %v208_v28 = vadd.f32 %v413_v26, %v207_v27 }
 0x11f   :  { %v211_v29 = vmax.f32 %v208_v28, 0.0 }
 0x121   :  { %v212_v30 = vpack.c.bf16 %v211_v29, %v211_v29 }
 0x123   :  { %289 = vmatmul.bf16.vlgmr.msra.gmra.mxu2 %v212_v30 }
 0x124   :  { %v209_v31 = vpop.f32.mrf.mxu1 }
 0x1a6   :  { %v290_v33 = vpop.f32.mrf.mxu2 }
 0x1a7   :  { %v291_v34 = vadd.f32 %v414_v32, %v290_v33 }
 0x1a9   :  { %294 = vst [vmem:[#allocation10] sm:$0xff] %v291_v34 }
 0x1aa   :  { %305 = dma.vmem_to_hbm [thread:$0]  %s301_s25, 128, %s303_s28, [#allocation4]  }
 0x1ae   :  { %v292_v35 = vpop.f32.mrf.mxu2 }
 0x1af   :  { %541 = dma.done.wait [#allocation4], 128  }
 0x1b0   :  { %542 = vsyncadd [#allocation4], 4294967168 }
 0x1b1   :  { %310 = vsyncpa [#allocation3], 1 }
 0x1b2   :  { %311 = vsyncpa [#allocation6], 1 }
 0x1b3   :  { %312 = vsyncpa [#allocation9], 1 }
 0x1b4   :  { %313 = vsyncpa [#allocation4], 1 }

</bundles_post_ra>
